<compile_context>
chip_gen: v6e
topology: v6e:2x2x1
jax: 0.10.0
libtpu: 0.0.40
codegen_flags: <defaults>
</compile_context>

<pallas_src>
import functools
import math

import jax
import jax.numpy as jnp
import numpy as np
from jax import lax
from jax.experimental import pallas as pl
from jax.experimental.pallas import tpu as pltpu


def _round_up(x, m):
    return -(-x // m) * m


def _padded_vmem_bytes(shape, dtype):
    """VMEM bytes of a block after (sublane, lane) tile padding."""
    item = np.dtype(dtype).itemsize
    sub = {4: 8, 2: 16, 1: 32}.get(item, 8)
    shape = tuple(shape)
    if len(shape) < 2:
        shape = (1,) * (2 - len(shape)) + shape
    lead = int(np.prod(shape[:-2])) if len(shape) > 2 else 1
    return lead * _round_up(shape[-2], sub) * _round_up(shape[-1], 128) * item


# ----------------------------- Pallas kernel ------------------------------ #
def _fused_baseblock_kernel(x_hbm, t_hbm, cmask_ref,
                            wc1_ref, bc1_ref, wgb1_ref, bgb1_ref,
                            wc2_ref, bc2_ref, wgb2_ref, bgb2_ref,
                            o_ref, xbuf, tbuf, sem,
                            *, tile_h, height, wp):
    """One (image, row-band) step of relu(TConv2(relu(TConv1(x, t)), t)).

    Flat-spatial layout: the padded image is stored row-major with row width
    Wp, so the input needed by 3x3 tap (dy, dx) at flat position p sits at
    flat position p + (dy+1)*Wp + (dx-1) of a band that starts two rows above
    the band's first layer-1 row.  Row-wrap junk only ever lands in the pad
    columns, which are masked / never stored.

    x_hbm : (N, Cin, (Hp+8)*Wp)  zero-padded flat image in HBM (bf16)
    t_hbm : (N, Dt , (Hp+8)*Wp)  zero-padded flat modulation input (bf16)
    cmask : (1, M1)              1.0 where the flat column is inside the image
    wc*   : (Cout, 9*Cin*)       3x3 conv weights, transposed + tap-fused
    bc*   : (Cout, 1)            conv bias (f32)
    wgb*  : (2*Cout, Dt)         [gamma; beta] 1x1 weights (fused matmul)
    bgb*  : (2*Cout, 1)          [gamma; beta] bias (f32)
    o_ref : (Cout, tile_h*Wp)    flat output band (f32)
    """
    i = pl.program_id(0)
    b = pl.program_id(1)
    r0 = b * tile_h                         # first output row of this band

    r1 = tile_h + 4                         # layer-1 rows held (halo + slack)
    m1 = r1 * wp
    m2 = tile_h * wp
    blen = (tile_h + 8) * wp
    cout1 = wc1_ref.shape[0]
    cout2 = wc2_ref.shape[0]
    cdtype = xbuf.dtype

    # ---- fetch this band (+halo) of x and t into VMEM --------------------
    src0 = pl.multiple_of(r0 * wp, 128)     # tile_h*wp is a multiple of 128
    cpx = pltpu.make_async_copy(x_hbm.at[i, :, pl.ds(src0, blen)], xbuf,
                                sem.at[0])
    cpt = pltpu.make_async_copy(t_hbm.at[i, :, pl.ds(src0, blen)], tbuf,
                                sem.at[1])
    cpx.start()
    cpt.start()
    cpx.wait()
    cpt.wait()

    xb = xbuf[...]                          # (Cin, blen)
    tb = tbuf[...]                          # (Dt,  blen)

    def taps_of(flat, length):
        # 3x3 taps as 9 constant-lane-offset slices, stacked along K.
        pieces = []
        for dy in range(3):
            for dx in range(3):
                off = (dy + 1) * wp + dx - 1
                pieces.append(lax.slice_in_dim(flat, off, off + length,
                                               axis=1))
        stacked = jnp.stack(pieces, axis=0)             # (9, C, length)
        return stacked.reshape(9 * flat.shape[0], length)

    # ---------------- layer 1: conv(Cout1, M1) = W @ im2col ---------------
    im1 = taps_of(xb, m1)                                       # (9*Cin, M1)
    conv1 = jnp.dot(wc1_ref[...], im1,
                    preferred_element_type=jnp.float32) + bc1_ref[...]
    t1 = lax.slice_in_dim(tb, 2 * wp, 2 * wp + m1, axis=1)      # (Dt, M1)
    gb1 = jnp.dot(wgb1_ref[...], t1,
                  preferred_element_type=jnp.float32) + bgb1_ref[...]
    h1 = jnp.maximum(conv1 * gb1[:cout1, :] + gb1[cout1:, :], 0.0)

    # Inter-layer zero pad: the unfused net zero-pads the HxW layer-1 map, so
    # halo positions outside the image must be forced to zero.  Columns are
    # band-invariant (precomputed cmask); rows need only two scalar bounds.
    lanes = lax.broadcasted_iota(jnp.int32, (1, m1), 1)
    lo = jnp.maximum(2 - r0, 0) * wp                # leading out-of-image rows
    hi = jnp.clip(height + 2 - r0, 0, r1) * wp      # first invalid tail row
    row_ok = (lanes >= lo) & (lanes < hi)
    h1 = jnp.where(row_ok, h1 * cmask_ref[...], 0.0).astype(cdtype)

    # ---------------- layer 2 on the VMEM/vreg-resident h1 ----------------
    im2 = taps_of(h1, m2)                                       # (9*Cout1, M2)
    conv2 = jnp.dot(wc2_ref[...], im2,
                    preferred_element_type=jnp.float32) + bc2_ref[...]
    t2 = lax.slice_in_dim(tb, 4 * wp, 4 * wp + m2, axis=1)      # (Dt, M2)
    gb2 = jnp.dot(wgb2_ref[...], t2,
                  preferred_element_type=jnp.float32) + bgb2_ref[...]
    out = jnp.maximum(conv2 * gb2[:cout2, :] + gb2[cout2:, :], 0.0)
    o_ref[...] = out.astype(o_ref.dtype)


# ------------------------------- JAX glue --------------------------------- #
def _fused_pallas(x_flat, t_flat, cmask, wc1, bc1, wgb1, bgb1,
                  wc2, bc2, wgb2, bgb2, *, tile_h, height, wp, h_pad):
    n, cin, _ = x_flat.shape
    dt = t_flat.shape[1]
    cout1 = wc1.shape[0]
    cout = wc2.shape[0]
    n_bands = h_pad // tile_h
    m1 = (tile_h + 4) * wp
    m2 = tile_h * wp
    blen = (tile_h + 8) * wp

    kernel = functools.partial(_fused_baseblock_kernel, tile_h=tile_h,
                               height=height, wp=wp)

    # Advisory cost estimate so XLA schedules around the custom call sensibly.
    steps = n * n_bands
    flops = 2 * steps * (m1 * (9 * cin + 2 * dt) * cout1
                         + m2 * (9 * cout1 + 2 * dt) * cout)
    bytes_accessed = int(sum(a.size * a.dtype.itemsize
                             for a in (x_flat, t_flat, cmask, wc1, wgb1,
                                       wc2, wgb2))
                         + n * cout * h_pad * wp * 4)
    cost = pl.CostEstimate(flops=int(flops), transcendentals=0,
                           bytes_accessed=bytes_accessed)

    # Padded-layout-aware VMEM budget (lane/sublane tile padding included),
    # capped below v7x's 64 MiB physical VMEM to leave compiler headroom.
    wdt = wc1.dtype
    resident = (
        _padded_vmem_bytes((cin, blen), x_flat.dtype)            # xbuf
        + _padded_vmem_bytes((dt, blen), t_flat.dtype)           # tbuf
        + 2 * _padded_vmem_bytes((cout, m2), np.float32)         # out (x2 buf)
        + 2 * _padded_vmem_bytes((1, m1), np.float32)            # cmask
        + 2 * sum(_padded_vmem_bytes(a.shape, a.dtype)
                  for a in (wc1, bc1, wgb1, bgb1, wc2, bc2, wgb2, bgb2)))
    intermediates = (
        _padded_vmem_bytes((9 * cin, m1), wdt)
        + _padded_vmem_bytes((9 * cout1, m2), wdt)
        + 4 * _padded_vmem_bytes((cout, m1), np.float32)
        + 2 * _padded_vmem_bytes((2 * cout, m1), np.float32))
    vmem_limit = int(min(48 * 1024 * 1024,
                         max(resident + 2 * intermediates, 32 * 1024 * 1024)))

    return pl.pallas_call(
        kernel,
        out_shape=jax.ShapeDtypeStruct((n, cout, h_pad * wp), jnp.float32),
        grid=(n, n_bands),
        in_specs=[
            pl.BlockSpec(memory_space=pl.ANY),       # x stays in HBM
            pl.BlockSpec(memory_space=pl.ANY),       # t stays in HBM
            pl.BlockSpec(cmask.shape, lambda i, b: (0, 0)),
            pl.BlockSpec(wc1.shape, lambda i, b: (0, 0)),
            pl.BlockSpec(bc1.shape, lambda i, b: (0, 0)),
            pl.BlockSpec(wgb1.shape, lambda i, b: (0, 0)),
            pl.BlockSpec(bgb1.shape, lambda i, b: (0, 0)),
            pl.BlockSpec(wc2.shape, lambda i, b: (0, 0)),
            pl.BlockSpec(bc2.shape, lambda i, b: (0, 0)),
            pl.BlockSpec(wgb2.shape, lambda i, b: (0, 0)),
            pl.BlockSpec(bgb2.shape, lambda i, b: (0, 0)),
        ],
        out_specs=pl.BlockSpec((None, cout, m2), lambda i, b: (i, 0, b)),
        scratch_shapes=[
            pltpu.VMEM((cin, blen), x_flat.dtype),
            pltpu.VMEM((dt, blen), t_flat.dtype),
            pltpu.SemaphoreType.DMA((2,)),
        ],
        compiler_params=pltpu.CompilerParams(
            dimension_semantics=("parallel", "parallel"),
            vmem_limit_bytes=vmem_limit),
        cost_estimate=cost,
    )(x_flat, t_flat, cmask, wc1, bc1, wgb1, bgb1, wc2, bc2, wgb2, bgb2)


def base_block_forward(x_nchw, tran_nchw, params, *, tile_h=8,
                       compute_dtype=jnp.bfloat16):
    """BaseBlock: relu(TConv2(relu(TConv1(x, t)), t)); NCHW in, NCHW out."""
    n, cin, h, w = x_nchw.shape
    dt = tran_nchw.shape[1]
    cout = params['conv2']['wc'].shape[-1]

    h_pad = _round_up(h, tile_h)                    # pad H instead of tile_h=H
    lane_req = 128 // math.gcd(tile_h, 128)
    wp = _round_up(w + 4, lane_req)                 # tile_h*wp % 128 == 0

    x = x_nchw.astype(compute_dtype)
    t = tran_nchw.astype(compute_dtype)
    # 2-px halo (two stacked 3x3 convs) plus alignment padding; NCHW so only
    # the trailing spatial dims are touched — no transposes anywhere.
    xq = jnp.pad(x, ((0, 0), (0, 0), (4, h_pad - h + 4), (2, wp - w - 2)))
    tq = jnp.pad(t, ((0, 0), (0, 0), (4, h_pad - h + 4), (2, wp - w - 2)))
    x_flat = xq.reshape(n, cin, (h_pad + 8) * wp)   # contiguous-dim merge
    t_flat = tq.reshape(n, dt, (h_pad + 8) * wp)

    # Column-validity mask for the inter-layer zero pad (band invariant).
    col = np.arange(wp)
    col_ok = ((col >= 2) & (col < w + 2)).astype(np.float32)
    cmask = jnp.asarray(np.tile(col_ok, tile_h + 4)[None, :])   # (1, M1)

    def pack(p):
        co = p['wc'].shape[3]
        wc = jnp.transpose(p['wc'], (3, 0, 1, 2)).reshape(co, -1)  # (Co, 9*Ci)
        bc = p['bc'].reshape(-1, 1).astype(jnp.float32)
        wgb = jnp.concatenate([p['wg'].T, p['wb'].T], axis=0)      # (2*Co, Dt)
        bgb = jnp.concatenate([p['bg'], p['bb']]).reshape(-1, 1
                                                          ).astype(jnp.float32)
        return wc.astype(compute_dtype), bc, wgb.astype(compute_dtype), bgb

    wc1, bc1, wgb1, bgb1 = pack(params['conv1'])
    wc2, bc2, wgb2, bgb2 = pack(params['conv2'])

    out_flat = _fused_pallas(x_flat, t_flat, cmask, wc1, bc1, wgb1, bgb1,
                             wc2, bc2, wgb2, bgb2,
                             tile_h=tile_h, height=h, wp=wp, h_pad=h_pad)
    # (N, Cout, h_pad*Wp) -> NCHW; drop the alignment / halo padding.
    return out_flat.reshape(n, cout, h_pad, wp)[:, :, :h, 2:2 + w]


def base_block_ref(x_nchw, tran_nchw, params, compute_dtype=jnp.bfloat16):
    """Pure-JAX reference (lax conv) with matching bf16-matmul / f32-acc math."""
    x = jnp.transpose(x_nchw, (0, 2, 3, 1))
    t = jnp.transpose(tran_nchw, (0, 2, 3, 1)).astype(compute_dtype)

    def tconv_relu(inp, p):
        conv = jax.lax.conv_general_dilated(
            inp.astype(compute_dtype), p['wc'].astype(compute_dtype),
            (1, 1), 'SAME', dimension_numbers=('NHWC', 'HWIO', 'NHWC'),
            preferred_element_type=jnp.float32) + p['bc']
        gamma = jnp.einsum('nhwd,dc->nhwc', t, p['wg'].astype(compute_dtype),
                           preferred_element_type=jnp.float32) + p['bg']
        beta = jnp.einsum('nhwd,dc->nhwc', t, p['wb'].astype(compute_dtype),
                          preferred_element_type=jnp.float32) + p['bb']
        return jnp.maximum(conv * gamma + beta, 0.0)

    out = tconv_relu(x, params['conv1'])
    out = tconv_relu(out, params['conv2'])
    return jnp.transpose(out, (0, 3, 1, 2))


def make_tconv_params(key, cin, cout, dim_in):
    k1, k2, k3 = jax.random.split(key, 3)
    return {
        'wc': 0.1 * jax.random.normal(k1, (3, 3, cin, cout), jnp.float32),
        'bc': jnp.zeros((cout,), jnp.float32),
        'wg': 0.1 * jax.random.normal(k2, (dim_in, cout), jnp.float32),
        'bg': jnp.ones((cout,), jnp.float32),
        'wb': 0.1 * jax.random.normal(k3, (dim_in, cout), jnp.float32),
        'bb': jnp.zeros((cout,), jnp.float32),
    }


if __name__ == "__main__":
    # Small shapes consistent with BaseBlock (in_channels == out_channels so
    # conv2 can consume conv1's output, as the PyTorch module requires).
    N, C_IN, C_OUT, DIM_IN, H, W = 2, 4, 4, 4, 16, 16

    key = jax.random.PRNGKey(0)
    kx, kt, kp1, kp2 = jax.random.split(key, 4)
    x = jax.random.normal(kx, (N, C_IN, H, W), jnp.float32)
    tran_x = jax.random.normal(kt, (N, DIM_IN, H, W), jnp.float32)

    params = {
        'conv1': make_tconv_params(kp1, C_IN, C_OUT, DIM_IN),
        'conv2': make_tconv_params(kp2, C_OUT, C_OUT, DIM_IN),
    }

    fwd = jax.jit(functools.partial(base_block_forward, tile_h=8))
    out = jax.block_until_ready(fwd(x, tran_x, params))
    ref = jax.block_until_ready(base_block_ref(x, tran_x, params))

    np.testing.assert_allclose(np.asarray(out), np.asarray(ref),
                               rtol=2e-2, atol=2e-2)
    assert out.shape == (N, C_OUT, H, W)
    print("KERNEL_OK")
</pallas_src>

<mosaic_0001>
module attributes {stable_mosaic.version = 11 : i64} {
  func.func @_fused_baseblock_kernel(%arg0: i32, %arg1: i32, %arg2: memref<2x4x768xbf16, #tpu.memory_space<any>>, %arg3: memref<2x4x768xbf16, #tpu.memory_space<any>>, %arg4: memref<1x384xf32, #tpu.memory_space<vmem>>, %arg5: memref<4x36xbf16, #tpu.memory_space<vmem>>, %arg6: memref<4x1xf32, #tpu.memory_space<vmem>>, %arg7: memref<8x4xbf16, #tpu.memory_space<vmem>>, %arg8: memref<8x1xf32, #tpu.memory_space<vmem>>, %arg9: memref<4x36xbf16, #tpu.memory_space<vmem>>, %arg10: memref<4x1xf32, #tpu.memory_space<vmem>>, %arg11: memref<8x4xbf16, #tpu.memory_space<vmem>>, %arg12: memref<8x1xf32, #tpu.memory_space<vmem>>, %arg13: memref<1x4x256xf32, #tpu.memory_space<vmem>>, %arg14: memref<4x512xbf16, #tpu.memory_space<vmem>>, %arg15: memref<4x512xbf16, #tpu.memory_space<vmem>>, %arg16: memref<2x!tpu.dma_semaphore, #tpu.memory_space<semaphore_mem>>) attributes {dimension_semantics = [#tpu.dimension_semantics<parallel>, #tpu.dimension_semantics<parallel>], iteration_bounds = array<i64: 2, 2>, scalar_prefetch = 0 : i64, scratch_operands = 3 : i64, tpu.core_type = #tpu.core_type<tc>, window_params = [{}, {}, {pipeline_mode = #tpu.pipeline_mode<synchronous>, transform_indices = @transform_2, window_bounds = array<i64: 1, 384>}, {pipeline_mode = #tpu.pipeline_mode<synchronous>, transform_indices = @transform_3, window_bounds = array<i64: 4, 36>}, {pipeline_mode = #tpu.pipeline_mode<synchronous>, transform_indices = @transform_4, window_bounds = array<i64: 4, 1>}, {pipeline_mode = #tpu.pipeline_mode<synchronous>, transform_indices = @transform_5, window_bounds = array<i64: 8, 4>}, {pipeline_mode = #tpu.pipeline_mode<synchronous>, transform_indices = @transform_6, window_bounds = array<i64: 8, 1>}, {pipeline_mode = #tpu.pipeline_mode<synchronous>, transform_indices = @transform_7, window_bounds = array<i64: 4, 36>}, {pipeline_mode = #tpu.pipeline_mode<synchronous>, transform_indices = @transform_8, window_bounds = array<i64: 4, 1>}, {pipeline_mode = #tpu.pipeline_mode<synchronous>, transform_indices = @transform_9, window_bounds = array<i64: 8, 4>}, {pipeline_mode = #tpu.pipeline_mode<synchronous>, transform_indices = @transform_10, window_bounds = array<i64: 8, 1>}, {transform_indices = @transform_11, window_bounds = array<i64: 1, 4, 256>}]} {
    %c8_i32 = arith.constant 8 : i32
    %0 = arith.muli %arg1, %c8_i32 : i32
    %c32_i32 = arith.constant 32 : i32
    %1 = arith.muli %0, %c32_i32 : i32
    %2 = tpu.assume_multiple %1, 128 : i32
    %c0_i32 = arith.constant 0 : i32
    %c0_i32_0 = arith.constant 0 : i32
    %3 = tpu.memref_slice %arg2[%arg0, %c0_i32_0, %2] : memref<2x4x768xbf16, #tpu.memory_space<any>> -> memref<1x4x512xbf16, #tpu.memory_space<any>>
    %4 = tpu.memref_squeeze %3 : memref<1x4x512xbf16, #tpu.memory_space<any>> -> memref<4x512xbf16, #tpu.memory_space<any>>
    %5 = tpu.memref_slice %arg16[%c0_i32] : memref<2x!tpu.dma_semaphore, #tpu.memory_space<semaphore_mem>> -> memref<1x!tpu.dma_semaphore, #tpu.memory_space<semaphore_mem>>
    %6 = tpu.memref_squeeze %5 : memref<1x!tpu.dma_semaphore, #tpu.memory_space<semaphore_mem>> -> memref<!tpu.dma_semaphore, #tpu.memory_space<semaphore_mem>>
    tpu.enqueue_dma source(%4 : memref<4x512xbf16, #tpu.memory_space<any>>) target(%arg14 : memref<4x512xbf16, #tpu.memory_space<vmem>>) target_semaphore(%6 : memref<!tpu.dma_semaphore, #tpu.memory_space<semaphore_mem>>)
    %c1_i32 = arith.constant 1 : i32
    %c0_i32_1 = arith.constant 0 : i32
    %7 = tpu.memref_slice %arg3[%arg0, %c0_i32_1, %2] : memref<2x4x768xbf16, #tpu.memory_space<any>> -> memref<1x4x512xbf16, #tpu.memory_space<any>>
    %8 = tpu.memref_squeeze %7 : memref<1x4x512xbf16, #tpu.memory_space<any>> -> memref<4x512xbf16, #tpu.memory_space<any>>
    %9 = tpu.memref_slice %arg16[%c1_i32] : memref<2x!tpu.dma_semaphore, #tpu.memory_space<semaphore_mem>> -> memref<1x!tpu.dma_semaphore, #tpu.memory_space<semaphore_mem>>
    %10 = tpu.memref_squeeze %9 : memref<1x!tpu.dma_semaphore, #tpu.memory_space<semaphore_mem>> -> memref<!tpu.dma_semaphore, #tpu.memory_space<semaphore_mem>>
    tpu.enqueue_dma source(%8 : memref<4x512xbf16, #tpu.memory_space<any>>) target(%arg15 : memref<4x512xbf16, #tpu.memory_space<vmem>>) target_semaphore(%10 : memref<!tpu.dma_semaphore, #tpu.memory_space<semaphore_mem>>)
    %c0_i32_2 = arith.constant 0 : i32
    %c0_i32_3 = arith.constant 0 : i32
    %11 = tpu.memref_slice %arg2[%arg0, %c0_i32_3, %2] : memref<2x4x768xbf16, #tpu.memory_space<any>> -> memref<1x4x512xbf16, #tpu.memory_space<any>>
    %12 = tpu.memref_squeeze %11 : memref<1x4x512xbf16, #tpu.memory_space<any>> -> memref<4x512xbf16, #tpu.memory_space<any>>
    %13 = tpu.memref_slice %arg16[%c0_i32_2] : memref<2x!tpu.dma_semaphore, #tpu.memory_space<semaphore_mem>> -> memref<1x!tpu.dma_semaphore, #tpu.memory_space<semaphore_mem>>
    %14 = tpu.memref_squeeze %13 : memref<1x!tpu.dma_semaphore, #tpu.memory_space<semaphore_mem>> -> memref<!tpu.dma_semaphore, #tpu.memory_space<semaphore_mem>>
    tpu.wait_dma2 semaphore(%14 : memref<!tpu.dma_semaphore, #tpu.memory_space<semaphore_mem>>) src(%12 : memref<4x512xbf16, #tpu.memory_space<any>>) dst(%arg14 : memref<4x512xbf16, #tpu.memory_space<vmem>>)
    %c1_i32_4 = arith.constant 1 : i32
    %c0_i32_5 = arith.constant 0 : i32
    %15 = tpu.memref_slice %arg3[%arg0, %c0_i32_5, %2] : memref<2x4x768xbf16, #tpu.memory_space<any>> -> memref<1x4x512xbf16, #tpu.memory_space<any>>
    %16 = tpu.memref_squeeze %15 : memref<1x4x512xbf16, #tpu.memory_space<any>> -> memref<4x512xbf16, #tpu.memory_space<any>>
    %17 = tpu.memref_slice %arg16[%c1_i32_4] : memref<2x!tpu.dma_semaphore, #tpu.memory_space<semaphore_mem>> -> memref<1x!tpu.dma_semaphore, #tpu.memory_space<semaphore_mem>>
    %18 = tpu.memref_squeeze %17 : memref<1x!tpu.dma_semaphore, #tpu.memory_space<semaphore_mem>> -> memref<!tpu.dma_semaphore, #tpu.memory_space<semaphore_mem>>
    tpu.wait_dma2 semaphore(%18 : memref<!tpu.dma_semaphore, #tpu.memory_space<semaphore_mem>>) src(%16 : memref<4x512xbf16, #tpu.memory_space<any>>) dst(%arg15 : memref<4x512xbf16, #tpu.memory_space<vmem>>)
    %c0 = arith.constant 0 : index
    %c0_6 = arith.constant 0 : index
    %19 = vector.load %arg14[%c0, %c0_6] : memref<4x512xbf16, #tpu.memory_space<vmem>>, vector<4x512xbf16>
    %c0_7 = arith.constant 0 : index
    %c0_8 = arith.constant 0 : index
    %20 = vector.load %arg15[%c0_7, %c0_8] : memref<4x512xbf16, #tpu.memory_space<vmem>>, vector<4x512xbf16>
    %21 = vector.extract_strided_slice %19 {offsets = [0, 31], sizes = [4, 384], strides = [1, 1]} : vector<4x512xbf16> to vector<4x384xbf16>
    %22 = vector.extract_strided_slice %19 {offsets = [0, 32], sizes = [4, 384], strides = [1, 1]} : vector<4x512xbf16> to vector<4x384xbf16>
    %23 = vector.extract_strided_slice %19 {offsets = [0, 33], sizes = [4, 384], strides = [1, 1]} : vector<4x512xbf16> to vector<4x384xbf16>
    %24 = vector.extract_strided_slice %19 {offsets = [0, 63], sizes = [4, 384], strides = [1, 1]} : vector<4x512xbf16> to vector<4x384xbf16>
    %25 = vector.extract_strided_slice %19 {offsets = [0, 64], sizes = [4, 384], strides = [1, 1]} : vector<4x512xbf16> to vector<4x384xbf16>
    %26 = vector.extract_strided_slice %19 {offsets = [0, 65], sizes = [4, 384], strides = [1, 1]} : vector<4x512xbf16> to vector<4x384xbf16>
    %27 = vector.extract_strided_slice %19 {offsets = [0, 95], sizes = [4, 384], strides = [1, 1]} : vector<4x512xbf16> to vector<4x384xbf16>
    %28 = vector.extract_strided_slice %19 {offsets = [0, 96], sizes = [4, 384], strides = [1, 1]} : vector<4x512xbf16> to vector<4x384xbf16>
    %29 = vector.extract_strided_slice %19 {offsets = [0, 97], sizes = [4, 384], strides = [1, 1]} : vector<4x512xbf16> to vector<4x384xbf16>
    %30 = vector.shape_cast %21 : vector<4x384xbf16> to vector<1x4x384xbf16>
    %31 = vector.shape_cast %22 : vector<4x384xbf16> to vector<1x4x384xbf16>
    %32 = vector.shape_cast %23 : vector<4x384xbf16> to vector<1x4x384xbf16>
    %33 = vector.shape_cast %24 : vector<4x384xbf16> to vector<1x4x384xbf16>
    %34 = vector.shape_cast %25 : vector<4x384xbf16> to vector<1x4x384xbf16>
    %35 = vector.shape_cast %26 : vector<4x384xbf16> to vector<1x4x384xbf16>
    %36 = vector.shape_cast %27 : vector<4x384xbf16> to vector<1x4x384xbf16>
    %37 = vector.shape_cast %28 : vector<4x384xbf16> to vector<1x4x384xbf16>
    %38 = vector.shape_cast %29 : vector<4x384xbf16> to vector<1x4x384xbf16>
    %39 = tpu.concatenate %30, %31, %32, %33, %34, %35, %36, %37, %38 in 0 : vector<1x4x384xbf16>, vector<1x4x384xbf16>, vector<1x4x384xbf16>, vector<1x4x384xbf16>, vector<1x4x384xbf16>, vector<1x4x384xbf16>, vector<1x4x384xbf16>, vector<1x4x384xbf16>, vector<1x4x384xbf16> -> vector<9x4x384xbf16>
    %40 = vector.shape_cast %39 : vector<9x4x384xbf16> to vector<36x384xbf16>
    %c0_9 = arith.constant 0 : index
    %c0_10 = arith.constant 0 : index
    %41 = vector.load %arg5[%c0_9, %c0_10] : memref<4x36xbf16, #tpu.memory_space<vmem>>, vector<4x36xbf16>
    %cst = arith.constant dense<0.000000e+00> : vector<4x384xf32>
    %42 = tpu.matmul %41, %40, %cst {dimension_numbers = #tpu.dot_dimension_numbers<[1], [0], [0], [1], [0, 0, 1, 1], [], []>} : vector<4x36xbf16>, vector<36x384xbf16>, vector<4x384xf32> -> vector<4x384xf32>
    %c0_11 = arith.constant 0 : index
    %c0_12 = arith.constant 0 : index
    %43 = vector.load %arg6[%c0_11, %c0_12] : memref<4x1xf32, #tpu.memory_space<vmem>>, vector<4x1xf32>
    %44 = vector.broadcast %43 : vector<4x1xf32> to vector<4x384xf32>
    %45 = arith.addf %42, %44 : vector<4x384xf32>
    %46 = vector.extract_strided_slice %20 {offsets = [0, 64], sizes = [4, 384], strides = [1, 1]} : vector<4x512xbf16> to vector<4x384xbf16>
    %c0_13 = arith.constant 0 : index
    %c0_14 = arith.constant 0 : index
    %47 = vector.load %arg7[%c0_13, %c0_14] : memref<8x4xbf16, #tpu.memory_space<vmem>>, vector<8x4xbf16>
    %cst_15 = arith.constant dense<0.000000e+00> : vector<8x384xf32>
    %48 = tpu.matmul %47, %46, %cst_15 {dimension_numbers = #tpu.dot_dimension_numbers<[1], [0], [0], [1], [0, 0, 1, 1], [], []>} : vector<8x4xbf16>, vector<4x384xbf16>, vector<8x384xf32> -> vector<8x384xf32>
    %c0_16 = arith.constant 0 : index
    %c0_17 = arith.constant 0 : index
    %49 = vector.load %arg8[%c0_16, %c0_17] : memref<8x1xf32, #tpu.memory_space<vmem>>, vector<8x1xf32>
    %50 = vector.broadcast %49 : vector<8x1xf32> to vector<8x384xf32>
    %51 = arith.addf %48, %50 : vector<8x384xf32>
    %52 = vector.extract_strided_slice %51 {offsets = [0, 0], sizes = [4, 384], strides = [1, 1]} : vector<8x384xf32> to vector<4x384xf32>
    %53 = arith.mulf %45, %52 : vector<4x384xf32>
    %54 = vector.extract_strided_slice %51 {offsets = [4, 0], sizes = [4, 384], strides = [1, 1]} : vector<8x384xf32> to vector<4x384xf32>
    %55 = arith.addf %53, %54 : vector<4x384xf32>
    %cst_18 = arith.constant 0.000000e+00 : f32
    %56 = vector.broadcast %cst_18 : f32 to vector<4x384xf32>
    %57 = arith.maximumf %55, %56 : vector<4x384xf32>
    %58 = tpu.iota {dimensions = array<i32: 1>} : vector<1x384xi32>
    %c2_i32 = arith.constant 2 : i32
    %59 = arith.subi %c2_i32, %0 : i32
    %c0_i32_19 = arith.constant 0 : i32
    %60 = arith.maxsi %59, %c0_i32_19 : i32
    %c32_i32_20 = arith.constant 32 : i32
    %61 = arith.muli %60, %c32_i32_20 : i32
    %c18_i32 = arith.constant 18 : i32
    %62 = arith.subi %c18_i32, %0 : i32
    %c0_i32_21 = arith.constant 0 : i32
    %c12_i32 = arith.constant 12 : i32
    %63 = arith.maxsi %c0_i32_21, %62 : i32
    %64 = arith.minsi %c12_i32, %63 : i32
    %c32_i32_22 = arith.constant 32 : i32
    %65 = arith.muli %64, %c32_i32_22 : i32
    %66 = vector.broadcast %61 : i32 to vector<1x384xi32>
    %67 = arith.cmpi sge, %58, %66 : vector<1x384xi32>
    %68 = vector.broadcast %65 : i32 to vector<1x384xi32>
    %69 = arith.cmpi slt, %58, %68 : vector<1x384xi32>
    %70 = arith.andi %67, %69 : vector<1x384xi1>
    %c0_23 = arith.constant 0 : index
    %c0_24 = arith.constant 0 : index
    %71 = vector.load %arg4[%c0_23, %c0_24] : memref<1x384xf32, #tpu.memory_space<vmem>>, vector<1x384xf32>
    %72 = vector.broadcast %71 : vector<1x384xf32> to vector<4x384xf32>
    %73 = arith.mulf %57, %72 : vector<4x384xf32>
    %cst_25 = arith.constant 0.000000e+00 : f32
    %74 = vector.shape_cast %70 : vector<1x384xi1> to vector<1x384xi1>
    %75 = vector.broadcast %74 : vector<1x384xi1> to vector<4x384xi1>
    %76 = vector.broadcast %cst_25 : f32 to vector<4x384xf32>
    %77 = arith.select %75, %73, %76 : vector<4x384xi1>, vector<4x384xf32>
    %78 = arith.truncf %77 : vector<4x384xf32> to vector<4x384xbf16>
    %79 = vector.extract_strided_slice %78 {offsets = [0, 31], sizes = [4, 256], strides = [1, 1]} : vector<4x384xbf16> to vector<4x256xbf16>
    %80 = vector.extract_strided_slice %78 {offsets = [0, 32], sizes = [4, 256], strides = [1, 1]} : vector<4x384xbf16> to vector<4x256xbf16>
    %81 = vector.extract_strided_slice %78 {offsets = [0, 33], sizes = [4, 256], strides = [1, 1]} : vector<4x384xbf16> to vector<4x256xbf16>
    %82 = vector.extract_strided_slice %78 {offsets = [0, 63], sizes = [4, 256], strides = [1, 1]} : vector<4x384xbf16> to vector<4x256xbf16>
    %83 = vector.extract_strided_slice %78 {offsets = [0, 64], sizes = [4, 256], strides = [1, 1]} : vector<4x384xbf16> to vector<4x256xbf16>
    %84 = vector.extract_strided_slice %78 {offsets = [0, 65], sizes = [4, 256], strides = [1, 1]} : vector<4x384xbf16> to vector<4x256xbf16>
    %85 = vector.extract_strided_slice %78 {offsets = [0, 95], sizes = [4, 256], strides = [1, 1]} : vector<4x384xbf16> to vector<4x256xbf16>
    %86 = vector.extract_strided_slice %78 {offsets = [0, 96], sizes = [4, 256], strides = [1, 1]} : vector<4x384xbf16> to vector<4x256xbf16>
    %87 = vector.extract_strided_slice %78 {offsets = [0, 97], sizes = [4, 256], strides = [1, 1]} : vector<4x384xbf16> to vector<4x256xbf16>
    %88 = vector.shape_cast %79 : vector<4x256xbf16> to vector<1x4x256xbf16>
    %89 = vector.shape_cast %80 : vector<4x256xbf16> to vector<1x4x256xbf16>
    %90 = vector.shape_cast %81 : vector<4x256xbf16> to vector<1x4x256xbf16>
    %91 = vector.shape_cast %82 : vector<4x256xbf16> to vector<1x4x256xbf16>
    %92 = vector.shape_cast %83 : vector<4x256xbf16> to vector<1x4x256xbf16>
    %93 = vector.shape_cast %84 : vector<4x256xbf16> to vector<1x4x256xbf16>
    %94 = vector.shape_cast %85 : vector<4x256xbf16> to vector<1x4x256xbf16>
    %95 = vector.shape_cast %86 : vector<4x256xbf16> to vector<1x4x256xbf16>
    %96 = vector.shape_cast %87 : vector<4x256xbf16> to vector<1x4x256xbf16>
    %97 = tpu.concatenate %88, %89, %90, %91, %92, %93, %94, %95, %96 in 0 : vector<1x4x256xbf16>, vector<1x4x256xbf16>, vector<1x4x256xbf16>, vector<1x4x256xbf16>, vector<1x4x256xbf16>, vector<1x4x256xbf16>, vector<1x4x256xbf16>, vector<1x4x256xbf16>, vector<1x4x256xbf16> -> vector<9x4x256xbf16>
    %98 = vector.shape_cast %97 : vector<9x4x256xbf16> to vector<36x256xbf16>
    %c0_26 = arith.constant 0 : index
    %c0_27 = arith.constant 0 : index
    %99 = vector.load %arg9[%c0_26, %c0_27] : memref<4x36xbf16, #tpu.memory_space<vmem>>, vector<4x36xbf16>
    %cst_28 = arith.constant dense<0.000000e+00> : vector<4x256xf32>
    %100 = tpu.matmul %99, %98, %cst_28 {dimension_numbers = #tpu.dot_dimension_numbers<[1], [0], [0], [1], [0, 0, 1, 1], [], []>} : vector<4x36xbf16>, vector<36x256xbf16>, vector<4x256xf32> -> vector<4x256xf32>
    %c0_29 = arith.constant 0 : index
    %c0_30 = arith.constant 0 : index
    %101 = vector.load %arg10[%c0_29, %c0_30] : memref<4x1xf32, #tpu.memory_space<vmem>>, vector<4x1xf32>
    %102 = vector.broadcast %101 : vector<4x1xf32> to vector<4x256xf32>
    %103 = arith.addf %100, %102 : vector<4x256xf32>
    %104 = vector.extract_strided_slice %20 {offsets = [0, 128], sizes = [4, 256], strides = [1, 1]} : vector<4x512xbf16> to vector<4x256xbf16>
    %c0_31 = arith.constant 0 : index
    %c0_32 = arith.constant 0 : index
    %105 = vector.load %arg11[%c0_31, %c0_32] : memref<8x4xbf16, #tpu.memory_space<vmem>>, vector<8x4xbf16>
    %cst_33 = arith.constant dense<0.000000e+00> : vector<8x256xf32>
    %106 = tpu.matmul %105, %104, %cst_33 {dimension_numbers = #tpu.dot_dimension_numbers<[1], [0], [0], [1], [0, 0, 1, 1], [], []>} : vector<8x4xbf16>, vector<4x256xbf16>, vector<8x256xf32> -> vector<8x256xf32>
    %c0_34 = arith.constant 0 : index
    %c0_35 = arith.constant 0 : index
    %107 = vector.load %arg12[%c0_34, %c0_35] : memref<8x1xf32, #tpu.memory_space<vmem>>, vector<8x1xf32>
    %108 = vector.broadcast %107 : vector<8x1xf32> to vector<8x256xf32>
    %109 = arith.addf %106, %108 : vector<8x256xf32>
    %110 = vector.extract_strided_slice %109 {offsets = [0, 0], sizes = [4, 256], strides = [1, 1]} : vector<8x256xf32> to vector<4x256xf32>
    %111 = arith.mulf %103, %110 : vector<4x256xf32>
    %112 = vector.extract_strided_slice %109 {offsets = [4, 0], sizes = [4, 256], strides = [1, 1]} : vector<8x256xf32> to vector<4x256xf32>
    %113 = arith.addf %111, %112 : vector<4x256xf32>
    %cst_36 = arith.constant 0.000000e+00 : f32
    %114 = vector.broadcast %cst_36 : f32 to vector<4x256xf32>
    %115 = arith.maximumf %113, %114 : vector<4x256xf32>
    %c0_37 = arith.constant 0 : index
    %c0_38 = arith.constant 0 : index
    %c0_39 = arith.constant 0 : index
    %116 = vector.load %arg13[%c0_37, %c0_38, %c0_39] : memref<1x4x256xf32, #tpu.memory_space<vmem>>, vector<1x4x256xf32>
    %117 = vector.shape_cast %116 : vector<1x4x256xf32> to vector<4x256xf32>
    %118 = vector.shape_cast %115 : vector<4x256xf32> to vector<1x4x256xf32>
    tpu.vector_store %arg13[%c0_37, %c0_38, %c0_39], %118 {strides = array<i32>} : memref<1x4x256xf32, #tpu.memory_space<vmem>>, vector<1x4x256xf32>,
    return
  }
  func.func @transform_2(%arg0: i32, %arg1: i32) -> (i32, i32) {
    %c0_i32 = arith.constant 0 : i32
    %c0_i32_0 = arith.constant 0 : i32
    %c0_i32_1 = arith.constant 0 : i32
    return %c0_i32, %c0_i32_0 : i32, i32
  }
  func.func @transform_3(%arg0: i32, %arg1: i32) -> (i32, i32) {
    %c0_i32 = arith.constant 0 : i32
    %c0_i32_0 = arith.constant 0 : i32
    %c0_i32_1 = arith.constant 0 : i32
    return %c0_i32, %c0_i32_0 : i32, i32
  }
  func.func @transform_4(%arg0: i32, %arg1: i32) -> (i32, i32) {
    %c0_i32 = arith.constant 0 : i32
    %c0_i32_0 = arith.constant 0 : i32
    %c0_i32_1 = arith.constant 0 : i32
    return %c0_i32, %c0_i32_0 : i32, i32
  }
  func.func @transform_5(%arg0: i32, %arg1: i32) -> (i32, i32) {
    %c0_i32 = arith.constant 0 : i32
    %c0_i32_0 = arith.constant 0 : i32
    %c0_i32_1 = arith.constant 0 : i32
    return %c0_i32, %c0_i32_0 : i32, i32
  }
  func.func @transform_6(%arg0: i32, %arg1: i32) -> (i32, i32) {
    %c0_i32 = arith.constant 0 : i32
    %c0_i32_0 = arith.constant 0 : i32
    %c0_i32_1 = arith.constant 0 : i32
    return %c0_i32, %c0_i32_0 : i32, i32
  }
  func.func @transform_7(%arg0: i32, %arg1: i32) -> (i32, i32) {
    %c0_i32 = arith.constant 0 : i32
    %c0_i32_0 = arith.constant 0 : i32
    %c0_i32_1 = arith.constant 0 : i32
    return %c0_i32, %c0_i32_0 : i32, i32
  }
  func.func @transform_8(%arg0: i32, %arg1: i32) -> (i32, i32) {
    %c0_i32 = arith.constant 0 : i32
    %c0_i32_0 = arith.constant 0 : i32
    %c0_i32_1 = arith.constant 0 : i32
    return %c0_i32, %c0_i32_0 : i32, i32
  }
  func.func @transform_9(%arg0: i32, %arg1: i32) -> (i32, i32) {
    %c0_i32 = arith.constant 0 : i32
    %c0_i32_0 = arith.constant 0 : i32
    %c0_i32_1 = arith.constant 0 : i32
    return %c0_i32, %c0_i32_0 : i32, i32
  }
  func.func @transform_10(%arg0: i32, %arg1: i32) -> (i32, i32) {
    %c0_i32 = arith.constant 0 : i32
    %c0_i32_0 = arith.constant 0 : i32
    %c0_i32_1 = arith.constant 0 : i32
    return %c0_i32, %c0_i32_0 : i32, i32
  }
  func.func @transform_11(%arg0: i32, %arg1: i32) -> (i32, i32, i32) {
    %c0_i32 = arith.constant 0 : i32
    %c0_i32_0 = arith.constant 0 : i32
    return %arg0, %c0_i32, %arg1 : i32, i32, i32
  }
}

</mosaic_0001>

<bundles_post_ra>
// kernel: base_block_forward.1
= control target key start
LH: loop header
LB: loop body
LE: loop exit
PB: predicated region body
PF: predicated region fallthrough
CT: control target
= control target key end

     0   :  { %s1724_s17 = smov 0   ;;  %s1726_s18 = smov 0   ;;  %s2054_s0 = inlined_call_operand.vmem [shape: bf16[2,4,768], index: 0, kind: input, shape index: {}]   ;;  %s2055_s1 = inlined_call_operand.vmem [shape: bf16[2,4,768], index: 1, kind: input, shape index: {}]   ;;  %s2056_s2 = inlined_call_operand.vmem [shape: f32[1,384], index: 2, kind: input, shape index: {}]   ;;  %s2057_s3 = inlined_call_operand.vmem [shape: bf16[4,36], index: 3, kind: input, shape index: {}]   ;;  %s2058_s4 = inlined_call_operand.vmem [shape: f32[4,1], index: 4, kind: input, shape index: {}]   ;;  %s2059_s5 = inlined_call_operand.vmem [shape: bf16[8,4], index: 5, kind: input, shape index: {}]   ;;  %s2060_s6 = inlined_call_operand.vmem [shape: f32[8,1], index: 6, kind: input, shape index: {}]   ;;  %s2061_s7 = inlined_call_operand.vmem [shape: bf16[4,36], index: 7, kind: input, shape index: {}]   ;;  %s2062_s8 = inlined_call_operand.vmem [shape: f32[4,1], index: 8, kind: input, shape index: {}]   ;;  %s2063_s9 = inlined_call_operand.vmem [shape: bf16[8,4], index: 9, kind: input, shape index: {}]   ;;  %s2064_s10 = inlined_call_operand.vmem [shape: f32[8,1], index: 10, kind: input, shape index: {}]   ;;  %s2065_s11 = inlined_call_operand.vmem [shape: f32[2,4,512], index: 11, kind: output, shape index: {}]  }
   0x1   :  { %s1728_s19 = smov 0   ;;  %s1730_s20 = smov 0  }
   0x2   :  { %s1732_s21 = smov 0  }
   0x3 LB: > { %2070 = sst [smem:[#allocation9_spill]] %s1641_s19  ;;  %s30_s22 = sadd.s32 1, %s1641_s19  ;;  %s1649_s21 = sphi %s1732_s21, %s21_s21   ;;  %s1645_s20 = sphi %s1730_s20, %s2082_s20   ;;  %s1641_s19 = sphi %s1728_s19, %s2081_s19   ;;  %s1637_s18 = sphi %s1726_s18, %s2080_s18   ;;  %s1633_s17 = sphi %s1724_s17, %s2079_s17  }
   0x4   : > { %2071 = sst [smem:[#allocation10_spill]] %s1645_s20  ;;  %s33_s23 = sadd.s32 1, %s1645_s20 }
   0x5   : > { %2072 = sst [smem:[#allocation11_spill]] %s1649_s21  ;;  %p31_p0 = scmp.ge.s32.totalorder %s30_s22, 2 }
   0x6   : > { %p1489_p1 = scmp.ge.s32.totalorder %s1649_s21, 1  ;;  %p293_p2 = scmp.lt.s32.totalorder %s1649_s21, 5 }
   0x7   : > { %s2084_s22 = smov (%p31_p0, %s30_s22), 0  ;;  %s2086_s23 = smov (!%p31_p0, %s33_s23), %s1645_s20 }
   0x8   : > { %2073 = sst [smem:[#allocation12_spill]] %s2084_s22  ;;  %p294_p3 = pnand %p1489_p1, %p293_p2 }
   0x9   : > { %p35_p4 = scmp.ge.s32.totalorder %s2086_s23, 2  ;;  %s1490_s24 = sshll.u32 (!%p294_p3), %s1633_s17, 1 }
   0xa   : > { %297 = sbr.rel (%p294_p3) target bundleno = 1003 (0x3eb), region = 56  ;;  %p329_p5 = scmp.lt.s32.totalorder (!%p294_p3), %s1637_s18, 1 }
   0xb   : > { %s2088_s23 = smov (%p35_p4, %s2086_s23), 0  ;;  %p331_p6 = scmp.lt.s32.totalorder (!%p294_p3), %s1490_s24, 3 }
   0xc   : > { %2074 = sst [smem:[#allocation13_spill]] %s2088_s23  ;;  %s1494_s28 = sshll.u32 (!%p294_p3), %s1633_s17, 8 }
   0xd   : > { %s341_s30 = sshra.s32 (!%p294_p3), %s1494_s28, 7  ;;  %s343_s13 = smul.u32 (!%p294_p3), 6, %s1637_s18 }
   0xf   : > { %s330_s26 = scalar_select %p329_p5, %s1637_s18, 1 }
  0x10   : > { %s2090_s24 = smov (!%p331_p6, %s1490_s24), 3  ;;  %s344_s23 = sadd.s32 %s343_s13, %s341_s30 }
  0x11   : > { %s1491_s27 = sshll.u32 %s330_s26, 2  ;;  %s1495_s22 = sshll.u32 %s344_s23, 1 }
  0x12   : > { %s334_s29 = sadd.s32 %s1491_s27, %s2090_s24  ;;  %s346_s21 = scalar_lea.vmem %s2054_s0, %s1495_s22 }
  0x13   : > { %s1492_s12 = sshll.u32 %s334_s29, 2  ;;  %v1772_v0 = vld [vmem:[%s346_s21] sm:$0xff] }
  0x14   : > { %s1767_s16 = scalar_lea.vmem %s2065_s11, %s1492_s12 }
  0x15   : > { %389 = vsyncadd [#allocation4], 128  ;;  %s391_s24 = scalar_lea.vmem %s2055_s1, %s1495_s22 }
  0x16   : > { %v1777_v1 = vld [vmem:[%s391_s24] sm:$0xff] }
  0x17   : > { %435 = vsyncadd [#allocation4 + $0x1], 128 }
  0x18   : > { %1627 = dma.done.wait [#allocation4], 128 }
  0x19   : > { %1628 = vsyncadd [#allocation4], 4294967168  ;;  %s1651_s18 = smov 62   ;;  %s1652_s23 = smov 94  }
  0x1a   : > { %480 = vrot.lane.b32.xlu0 %v1772_v0, %s1651_s18  ;;  %465 = vrot.lane.b32.xlu1 %v1772_v0, %s1652_s23 }
  0x1b   : > { %1629 = dma.done.wait [#allocation4 + $0x1], 128 }
  0x1c   : > { %1630 = vsyncadd [#allocation4 + $0x1], 4294967168  ;;  %s1653_s19 = smov 64   ;;  %s1654_s20 = smov 95   ;;  %v1659_v2 = vmov 1983009808   ;;  %v499_v4 = vlaneseq  ;;  %v724_v62 = vcombine.high %v1777_v1, %v1777_v1 }
  0x1d   : > { %s1655_s21 = smov 63   ;;  %s1656_s22 = smov 127   ;;  %v497_v3 = vunpack.c.l.s4 %v1659_v2  ;;  %vm483_vm0 = vcmask 506880   ;;  %v1660_v10 = vmov 0.0   ;;  %vm463_vm1 = vcmask 777216  }
  0x1e   : > { %470 = vrot.lane.b32.xlu1 %v1772_v0, %s1653_s19  ;;  %460 = vrot.lane.b32.xlu0 %v1772_v0, %s1654_s20  ;;  %s1657_s25 = smov 126   ;;  %s1658_s27 = smov 96   ;;  %v1796_v6 = vshrl.u32 %v499_v4, 7  ;;  %vm468_vm2 = vcmask 769024   ;;  %vm473_vm3 = vcmask 523264   ;;  %vm478_vm4 = vcmask 515072  }
  0x1f   : > { %v498_v5 = vunpack.c.0.s8 %v497_v3  ;;  %1536 = vmatprep.subr.bf16.mxu1 %v1660_v10  ;;  %s1661_s28 = smov 97   ;;  %vm448_vm5 = vcmask 1039360   ;;  %vm453_vm6 = vcmask 1031168   ;;  %vm458_vm7 = vcmask 785408   ;;  %s2075_s12 = sshll.u32 %s1633_s17, 3 }
  0x20   : > { %v1662_v52 = vmov 0   ;;  %vm1663_vm8 = vmmov 0   ;;  %vm605_vm9 = vcmask 793600   ;;  %vm625_vm10 = vcmask 1041408   ;;  %s872_s13 = ssub.s32 18, %s2075_s12  ;;  %s2076_s14 = smov %s2075_s12 }
  0x21   : > { %v1799_v7 = vsub.s32 %v498_v5, %v1796_v6  ;;  %667 = vmatprep.mubr.bf16.mxu0 %v1662_v52  ;;  %1605 = vset.pattern.permute.xlu0 %v1662_v52  ;;  %vm2069_vm11 = vcmask 293888   ;;  %vm752_vm12 = vcmask 31744   ;;  %s868_s15 = ssub.s32 2, %s2076_s14  ;;  %p873_p7 = scmp.gt.s32.totalorder %s872_s13, 0 }
  0x22   : > { %475 = vrot.lane.b32.xlu0 %v1772_v0, %s1655_s21  ;;  %445 = vrot.lane.b32.xlu1 %v1772_v0, %s1656_s22  ;;  %p869_p8 = scmp.gt.s32.totalorder %s868_s15, 0  ;;  %p1504_p9 = scmp.lt.s32.totalorder %s872_s13, 12 }
  0x23   : > { %1606 = vset.pattern.permute.xlu1 %v1662_v52  ;;  %1542 = vmatprep.mubr.msk.bf16.mxu1 %vm1663_vm8, %v1660_v10  ;;  %v731_v61 = vrot.slane %v1777_v1, %v1799_v7  ;;  %v1846_v3 = vrot.slane %v724_v62, %v1799_v7  ;;  %v486_v1 = vld [vmem:[%s2058_s4] sm:$0xf]  ;;  %s2092_s13 = smov (!%p873_p7, %s872_s13), 0 }
  0x24   : > { %s2094_s15 = smov (!%p869_p8, %s868_s15), 0  ;;  %s2096_s13 = smov (!%p1504_p9, %s2092_s13), 12 }
  0x25   : > { %v1843_v2 = vcombine.high %v731_v61, %v731_v61  ;;  %v740_v5 = vcombine.high %v1846_v3, %v1846_v3  ;;  %s1503_s26 = sshll.u32 %s2094_s15, 5  ;;  %s1509_s24 = sshll.u32 %s2096_s13, 5 }
  0x26   : > { %450 = vrot.lane.b32.xlu0 %v1772_v0, %s1657_s25  ;;  %455 = vrot.lane.b32.xlu1 %v1772_v0, %s1658_s27  ;;  %v882_v62 = vstv %s1509_s24 }
  0x8c   : > { %v481_v8 = vpop.permute.xlu0 %480  ;;  %v466_v9 = vpop.permute.xlu1 %465 }
  0x8d   : > { %v482_v11 = vrot.slane %v481_v8, 2  ;;  %v467_v17 = vrot.slane %v466_v9, 2 }
  0x8f   : > { %v484_v12 = vsel %vm483_vm0, %v481_v8, %v482_v11  ;;  %v469_v25 = vsel %vm468_vm2, %v466_v9, %v467_v17  ;;  %v717_v8 = vld [vmem:[%s2060_s6] sm:$0xff] }
  0x90   : > { %v564_v13 = vcombine.high %v484_v12, %v484_v12  ;;  %v571_v14 = vrot.slane %v484_v12, %v1799_v7  ;;  %v471_v15 = vpop.permute.xlu1 %470  ;;  %v461_v16 = vpop.permute.xlu0 %460 }
  0x91   : > { %v462_v18 = vrot.slane %v461_v16, 2  ;;  %v472_v21 = vrot.slane %v471_v15, 2 }
  0x92   : > { %597 = vrot.lane.b32.xlu0 %v571_v14, %s1661_s28  ;;  %v579_v19 = vcombine.high %v571_v14, %v571_v14  ;;  %v578_v20 = vrot.slane %v564_v13, %v1799_v7 }
  0x93   : > { %v464_v22 = vsel %vm463_vm1, %v461_v16, %v462_v18  ;;  %v474_v30 = vsel %vm473_vm3, %v471_v15, %v472_v21 }
  0x94   : > { %v476_v23 = vpop.permute.xlu0 %475  ;;  %599 = vrot.lane.b32.xlu1 %v579_v19, %s1661_s28  ;;  %v446_v24 = vpop.permute.xlu1 %445  ;;  %v528_v27 = vcombine.low %v464_v22, %v469_v25  ;;  %v529_v28 = vcombine.high %v464_v22, %v469_v25  ;;  %v580_v29 = vcombine.high %v578_v20, %v578_v20 }
  0x95   : > { %v477_v26 = vrot.slane %v476_v23, 2  ;;  %v447_v32 = vrot.slane %v446_v24, 2 }
  0x96   : > { %601 = vrot.lane.b32.xlu0 %v578_v20, %s1661_s28  ;;  %v538_v39 = vrot.slane %v528_v27, %v1799_v7  ;;  %v545_v40 = vrot.slane %v529_v28, %v1799_v7 }
  0x97   : > { %v479_v31 = vsel %vm478_vm4, %v476_v23, %v477_v26  ;;  %v449_v43 = vsel %vm448_vm5, %v446_v24, %v447_v32 }
  0x98   : > { %v530_v33 = vcombine.low %v474_v30, %v479_v31  ;;  %v531_v34 = vcombine.high %v474_v30, %v479_v31  ;;  %v451_v35 = vpop.permute.xlu0 %450  ;;  %603 = vrot.lane.b32.xlu1 %v580_v29, %s1661_s28  ;;  %v456_v36 = vpop.permute.xlu1 %455  ;;  %v492_v50 = vcombine.low %v1772_v0, %v449_v43  ;;  %v493_v51 = vcombine.high %v1772_v0, %v449_v43 }
  0x99   : > { %v452_v37 = vrot.slane %v451_v35, 2  ;;  %v457_v38 = vrot.slane %v456_v36, 2  ;;  %v1314_v43 = vsel %vm625_vm10, %v1843_v2, 0 }
  0x9a   : > { %v552_v41 = vrot.slane %v530_v33, %v1799_v7  ;;  %v559_v42 = vrot.slane %v531_v34, %v1799_v7  ;;  %v502_v57 = vrot.slane %v492_v50, %v1799_v7  ;;  %v509_v58 = vrot.slane %v493_v51, %v1799_v7  ;;  %v485_v33 = vld [vmem:[%s2057_s3] sm:$0x3] }
  0x9b   : > { %v454_v44 = vsel %vm453_vm6, %v451_v35, %v452_v37  ;;  %v459_v45 = vsel %vm458_vm7, %v456_v36, %v457_v38 }
  0x9c   : > { %v494_v46 = vcombine.low %v454_v44, %v459_v45  ;;  %v495_v47 = vcombine.high %v454_v44, %v459_v45  ;;  %v561_v48 = vcombine.high %v538_v39, %v552_v41  ;;  %v562_v49 = vcombine.low %v545_v40, %v559_v42  ;;  %v1303_v44 = vld [vmem:[%s2063_s9] sm:$0xf] }
  0x9d   : > { %v560_v55 = vcombine.low %v538_v39, %v552_v41  ;;  %v563_v56 = vcombine.high %v545_v40, %v559_v42 }
  0x9e   : > { %591 = vrot.lane.b32.xlu0 %v561_v48, %s1661_s28  ;;  %593 = vrot.lane.b32.xlu1 %v562_v49, %s1661_s28  ;;  %v516_v53 = vrot.slane %v494_v46, %v1799_v7  ;;  %v523_v54 = vrot.slane %v495_v47, %v1799_v7 }
  0xa0   : > { %v526_v59 = vcombine.low %v509_v58, %v523_v54  ;;  %v525_v60 = vcombine.high %v502_v57, %v516_v53  ;;  %v527_v63 = vcombine.high %v509_v58, %v523_v54  ;;  %v524_v0 = vcombine.low %v502_v57, %v516_v53 }
  0xa1   : > { %v893_v57 = vsub.s32 0, %v1796_v6 }
  0xa2   : > { %589 = vrot.lane.b32.xlu0 %v560_v55, %s1661_s28  ;;  %595 = vrot.lane.b32.xlu1 %v563_v56, %s1661_s28  ;;  %v865_v56 = vand.u32 127, %v499_v4 }
  0xa4   : > { %vm883_vm14 = vcmp.lt.s32.totalorder %v865_v56, %v882_v62 }
  0xa6   : > { %585 = vrot.lane.b32.xlu1 %v526_v59, %s1661_s28  ;;  %583 = vrot.lane.b32.xlu0 %v525_v60, %s1661_s28 }
  0xaa   : > { %587 = vrot.lane.b32.xlu1 %v527_v63, %s1661_s28  ;;  %581 = vrot.lane.b32.xlu0 %v524_v0, %s1661_s28  ;;  %v889_v63 = vld [vmem:[%s2056_s2] sm:$0x7] }
  0xae   : > { %743 = vrot.lane.b32.xlu1 %v1843_v2, %s1653_s19  ;;  %741 = vrot.lane.b32.xlu0 %v731_v61, %s1653_s19  ;;  %v878_v61 = vstv %s1503_s26  ;;  %v866_v2 = vadd.s32 128, %v865_v56 }
  0xaf   : > { %vm879_vm13 = vcmp.ge.s32.totalorder %v865_v56, %v878_v61 }
  0xb0   : > { %vm880_vm15 = vcmp.ge.s32.totalorder %v866_v2, %v878_v61 }
  0xb2   : > { %747 = vrot.lane.b32.xlu1 %v740_v5, %s1653_s19  ;;  %745 = vrot.lane.b32.xlu0 %v1846_v3, %s1653_s19 }
  0xb6   : > { %489 = vperm.xlu0 %1605, %v486_v1   ;;  %720 = vperm.xlu1 %1606, %v717_v8  }
 0x104   : > { %v598_v9 = vpop.permute.xlu0 %597 }
 0x106   : > { %v600_v11 = vpop.permute.xlu1 %599 }
 0x107   : > { %v612_v12 = vsel %vm605_vm9, %v598_v9, %v600_v11 }
 0x108   : > { %v602_v13 = vpop.permute.xlu0 %601  ;;  %v627_v16 = vsel %vm625_vm10, %v612_v12, 0  ;;  %v894_v12 = vrot.slane %v889_v63, %v893_v57 }
 0x109   : > { %v613_v14 = vsel %vm605_vm9, %v600_v11, %v602_v13 }
 0x10a   : > { %1497 = vmatprep.subr.msk.bf16.mxu0 %vm625_vm10, %v613_v14  ;;  %v604_v15 = vpop.permute.xlu1 %603 }
 0x10b   : > { %646 = vmatpush1.bf16.msra.mxu0 %v627_v16  ;;  %v614_v17 = vsel %vm605_vm9, %v602_v13, %v604_v15 }
 0x10c   : > { %v633_v18 = vsel %vm625_vm10, %v614_v17, 0 }
 0x10d   : > { %1537 = vmatpush3.bf16.msra.mxu1 %v633_v18 }
 0x10e   : > { %1538 = vmatprep.subr.bf16.mxu1 %v1660_v10 }
 0x110   : > { %v592_v19 = vpop.permute.xlu0 %591  ;;  %v594_v20 = vpop.permute.xlu1 %593 }
 0x111   : > { %v610_v21 = vsel %vm605_vm9, %v592_v19, %v594_v20 }
 0x112   : > { %647 = vmatprep.subr.bf16.mxu0 %v610_v21 }
 0x114   : > { %v590_v22 = vpop.permute.xlu0 %589  ;;  %v596_v23 = vpop.permute.xlu1 %595 }
 0x115   : > { %v609_v24 = vsel %vm605_vm9, %v590_v22, %v592_v19  ;;  %v611_v25 = vsel %vm605_vm9, %v594_v20, %v596_v23 }
 0x116   : > { %648 = vmatpush1.bf16.msra.mxu0 %v609_v24  ;;  %1539 = vmatpush3.bf16.msra.mxu1 %v611_v25 }
 0x117   : > { %1540 = vmatprep.subr.bf16.mxu1 %v1660_v10 }
 0x118   : > { %v584_v26 = vpop.permute.xlu0 %583  ;;  %v586_v27 = vpop.permute.xlu1 %585 }
 0x119   : > { %v607_v28 = vsel %vm605_vm9, %v584_v26, %v586_v27 }
 0x11a   : > { %649 = vmatprep.subr.bf16.mxu0 %v607_v28 }
 0x11c   : > { %v582_v29 = vpop.permute.xlu0 %581  ;;  %v588_v30 = vpop.permute.xlu1 %587 }
 0x11d   : > { %v606_v31 = vsel %vm605_vm9, %v582_v29, %v584_v26  ;;  %v608_v32 = vsel %vm605_vm9, %v586_v27, %v588_v30 }
 0x11e   : > { %650 = vmatpush1.bf16.msra.mxu0 %v606_v31  ;;  %1541 = vmatpush3.bf16.msra.mxu1 %v608_v32 }
 0x11f   : > { %1546 = vmatprep.subr.bf16.mxu1 %v1660_v10 }
 0x120   : > { %v742_v34 = vpop.permute.xlu0 %741  ;;  %v744_v35 = vpop.permute.xlu1 %743 }
 0x121   : > { %1498 = vmatmul.mubr.msk.bf16.vlgmr.msra.gmra.mxu0 %vm2069_vm11, %v485_v33  ;;  %1543 = vmatmul.mubr.msk.bf16.vlgmr.msra.gmra.mxu1 %vm2069_vm11, %v485_v33  ;;  %v749_v36 = vsel %vm473_vm3, %v742_v34, %v744_v35  ;;  %v901_v33 = vsub.s32 2, %v1796_v6 }
 0x122   : > { %797 = vmatprep.mubr.bf16.mxu0 %v1662_v52  ;;  %1548 = vmatprep.mubr.msk.bf16.mxu1 %vm1663_vm8, %v1660_v10  ;;  %v757_v41 = vsel %vm625_vm10, %v749_v36, 0  ;;  %v716_v10 = vld [vmem:[%s2059_s5] sm:$0xf]  ;;  %vm884_vm8 = vcmp.lt.s32.totalorder %v866_v2, %v882_v62 }
 0x123   : > { %vm887_vm11 = vmand %vm880_vm15, %vm884_vm8 }
 0x124   : > { %v746_v37 = vpop.permute.xlu0 %745  ;;  %v748_v38 = vpop.permute.xlu1 %747 }
 0x125   : > { %v750_v39 = vsel %vm473_vm3, %v744_v35, %v746_v37  ;;  %v751_v40 = vsel %vm473_vm3, %v746_v37, %v748_v38  ;;  %v867_v35 = vadd.s32 256, %v865_v56  ;;  %v902_v37 = vrot.slane %v889_v63, %v901_v33 }
 0x126   : > { %v763_v42 = vsel %vm625_vm10, %v751_v40, 0  ;;  %1500 = vmatprep.subr.msk.bf16.mxu0 %vm625_vm10, %v750_v39 }
 0x127   : > { %780 = vmatpush1.bf16.msra.mxu0 %v757_v41  ;;  %1547 = vmatpush3.bf16.msra.mxu1 %v763_v42 }
 0x128   : > { %1522 = vmatprep.subr.msk.bf16.mxu1 %vm625_vm10, %v1846_v3  ;;  %v897_v3 = vsub.s32 1, %v1796_v6 }
 0x12a   : > { %1501 = vmatmul.mubr.msk.bf16.vlgmr.msra.gmra.mxu0 %vm752_vm12, %v716_v10  ;;  %1549 = vmatmul.mubr.msk.bf16.vlgmr.msra.gmra.mxu1 %vm752_vm12, %v716_v10  ;;  %v898_v19 = vrot.slane %v889_v63, %v897_v3 }
 0x12b   : > { %1351 = vmatprep.mubr.bf16.mxu1 %v1662_v52  ;;  %1294 = vmatprep.mubr.bf16.mxu0 %v1662_v52 }
 0x12c   : > { %1334 = vmatpush1.bf16.msra.mxu1 %v1314_v43 }
 0x131   : > { %v490_v53 = vpop.permute.xlu0 %489  ;;  %v721_v54 = vpop.permute.xlu1 %720 }
 0x132   : > { %1523 = vmatmul.mubr.msk.bf16.vlgmr.msra.gmra.mxu1 %vm752_vm12, %v1303_v44  ;;  %vm886_vm12 = vmand %vm879_vm13, %vm883_vm14  ;;  %vm881_vm13 = vcmp.ge.s32.totalorder %v867_v35, %v878_v61 }
 0x1e1   : > { %v669_v45 = vpop.f32.mrf.mxu0  ;;  %v710_v46 = vpop.f32.mrf.mxu1 }
 0x1e2   : > { %v670_v59 = vadd.f32 %v669_v45, %v490_v53  ;;  %v711_v11 = vadd.f32 %v710_v46, %v490_v53 }
 0x1e3   : > { %v671_v47 = vpop.f32.mrf.mxu0  ;;  %v1544_v48 = vpop.f32.mrf.mxu1 }
 0x1e4   : > { %v672_v1 = vadd.f32 %v671_v47, %v490_v53 }
 0x1e5   : > { %v673_v49 = vpop.f32.mrf.mxu0  ;;  %v713_v50 = vpop.f32.mrf.mxu1 }
 0x1e7   : > { %v674_v51 = vpop.f32.mrf.mxu0  ;;  %v1545_v52 = vpop.f32.mrf.mxu1 }
 0x1ea   : > { %v799_v55 = vpop.f32.mrf.mxu0  ;;  %v840_v58 = vpop.f32.mrf.mxu1 }
 0x1eb   : > { %v800_v60 = vadd.f32 %v799_v55, %v721_v54  ;;  %v841_v18 = vadd.f32 %v840_v58, %v721_v54 }
 0x1ec   : > { %v801_v0 = vpop.f32.mrf.mxu0  ;;  %v1550_v5 = vpop.f32.mrf.mxu1 }
 0x1ed   : > { %v846_v8 = vmul.f32 %v800_v60, %v670_v59  ;;  %v852_v9 = vrot.slane %v800_v60, 4  ;;  %v802_v4 = vadd.f32 %v801_v0, %v721_v54  ;;  %v848_v26 = vmul.f32 %v841_v18, %v711_v11 }
 0x1ee   : > { %v803_v13 = vpop.f32.mrf.mxu0  ;;  %v843_v14 = vpop.f32.mrf.mxu1  ;;  %v854_v27 = vrot.slane %v841_v18, 4 }
 0x1ef   : > { %v858_v15 = vadd.f32 %v852_v9, %v846_v8  ;;  %v847_v16 = vmul.f32 %v802_v4, %v672_v1  ;;  %v853_v17 = vrot.slane %v802_v4, 4 }
 0x1f0   : > { %v804_v20 = vpop.f32.mrf.mxu0  ;;  %v1551_v21 = vpop.f32.mrf.mxu1  ;;  %v860_v32 = vadd.f32 %v854_v27, %v848_v26 }
 0x1f1   : > { %v861_v22 = vmax.f32 %v858_v15, 0.0  ;;  %v859_v23 = vadd.f32 %v853_v17, %v847_v16 }
 0x1f2   : > { %v863_v36 = vmax.f32 %v860_v32, 0.0 }
 0x1f3   : > { %v906_v24 = vmul.f32 %v894_v12, %v861_v22  ;;  %v862_v25 = vmax.f32 %v859_v23, 0.0 }
 0x1f4   : > { %v908_v38 = vmul.f32 %v902_v37, %v863_v36 }
 0x1f5   : > { %v1915_v28 = vsel %vm886_vm12, %v906_v24, 0.0  ;;  %v907_v29 = vmul.f32 %v898_v19, %v862_v25 }
 0x1f6   : > { %v918_v30 = vpack.c.bf16 %v1915_v28, %v1915_v28 }
 0x1f7   : > { %v1919_v31 = vsel %vm887_vm11, %v907_v29, 0.0  ;;  %vm885_vm11 = vcmp.lt.s32.totalorder %v867_v35, %v882_v62 }
 0x1f8   : > { %v1510_v34 = vpack.c.bf16 %v1919_v31, %v1915_v28  ;;  %948 = vrot.lane.b32.xlu0 %v918_v30, %s1654_s20  ;;  %980 = vrot.lane.b32.xlu1 %v918_v30, %s1651_s18  ;;  %vm888_vm14 = vmand %vm881_vm13, %vm885_vm11  ;;  %v919_v39 = vpack.c.bf16 %v1919_v31, %v1919_v31  ;;  %v1353_v31 = vpop.f32.mrf.mxu1 }
 0x1f9   : > { %v917_v6 = vsel %vm888_vm14, %v908_v38, 0.0 }
 0x1fa   : > { %v1934_v40 = vpack.c.bf16 %v917_v6, %v917_v6 }
 0x1fc   : > { %964 = vrot.lane.b32.xlu0 %v918_v30, %s1653_s19  ;;  %956 = vrot.lane.b32.xlu1 %v918_v30, %s1652_s23 }
 0x200   : > { %924 = vrot.lane.b32.xlu0 %v918_v30, %s1656_s22  ;;  %972 = vrot.lane.b32.xlu1 %v918_v30, %s1655_s21 }
 0x204   : > { %940 = vrot.lane.b32.xlu0 %v918_v30, %s1658_s27  ;;  %932 = vrot.lane.b32.xlu1 %v918_v30, %s1657_s25 }
 0x208   : > { %982 = vrot.lane.b32.xlu0 %v919_v39, %s1651_s18  ;;  %984 = vrot.lane.b32.xlu1 %v1934_v40, %s1651_s18 }
 0x20c   : > { %952 = vrot.lane.b32.xlu0 %v1934_v40, %s1654_s20  ;;  %950 = vrot.lane.b32.xlu1 %v919_v39, %s1654_s20 }
 0x210   : > { %958 = vrot.lane.b32.xlu0 %v919_v39, %s1652_s23  ;;  %960 = vrot.lane.b32.xlu1 %v1934_v40, %s1652_s23 }
 0x214   : > { %968 = vrot.lane.b32.xlu0 %v1934_v40, %s1653_s19  ;;  %966 = vrot.lane.b32.xlu1 %v919_v39, %s1653_s19 }
 0x218   : > { %974 = vrot.lane.b32.xlu0 %v919_v39, %s1655_s21  ;;  %976 = vrot.lane.b32.xlu1 %v1934_v40, %s1655_s21 }
 0x21c   : > { %928 = vrot.lane.b32.xlu0 %v1934_v40, %s1656_s22  ;;  %926 = vrot.lane.b32.xlu1 %v919_v39, %s1656_s22 }
 0x220   : > { %934 = vrot.lane.b32.xlu0 %v919_v39, %s1657_s25  ;;  %936 = vrot.lane.b32.xlu1 %v1934_v40, %s1657_s25 }
 0x224   : > { %944 = vrot.lane.b32.xlu0 %v1934_v40, %s1658_s27  ;;  %942 = vrot.lane.b32.xlu1 %v919_v39, %s1658_s27 }
 0x26a   : > { %v949_v41 = vpop.permute.xlu0 %948  ;;  %v981_v42 = vpop.permute.xlu1 %980 }
 0x26e   : > { %v965_v10 = vpop.permute.xlu0 %964  ;;  %v957_v43 = vpop.permute.xlu1 %956 }
 0x272   : > { %v925_v44 = vpop.permute.xlu0 %924  ;;  %v973_v45 = vpop.permute.xlu1 %972 }
 0x276   : > { %v1960_v46 = vpop.permute.xlu0 %940  ;;  %v933_v47 = vpop.permute.xlu1 %932 }
 0x27a   : > { %v983_v48 = vpop.permute.xlu0 %982  ;;  %v985_v49 = vpop.permute.xlu1 %984 }
 0x27b   : > { %v986_v50 = vsel %vm483_vm0, %v981_v42, %v983_v48  ;;  %v987_v51 = vsel %vm483_vm0, %v983_v48, %v985_v49  ;;  %v1130_v52 = vrot.slane %v985_v49, %v1799_v7  ;;  %vm2077_vm0 = vcmask 293888  }
 0x27c   : > { %v1116_v53 = vcombine.low %v986_v50, %v987_v51 }
 0x27d   : > { %v1519_v54 = vcombine.low %v1130_v52, %v1130_v52 }
 0x27e   : > { %v1123_v55 = vrot.slane %v1116_v53, %v1799_v7  ;;  %v953_v56 = vpop.permute.xlu0 %952  ;;  %v951_v57 = vpop.permute.xlu1 %950 }
 0x27f   : > { %v1223_v58 = vrot.slane %v1519_v54, %v1799_v7  ;;  %v954_v3 = vsel %vm463_vm1, %v949_v41, %v951_v57  ;;  %v955_v5 = vsel %vm463_vm1, %v951_v57, %v953_v56  ;;  %v1066_v13 = vrot.slane %v953_v56, %v1799_v7 }
 0x280   : > { %v1131_v59 = vcombine.low %v1123_v55, %v1130_v52  ;;  %v1052_v14 = vcombine.low %v954_v3, %v955_v5 }
 0x281   : > { %1241 = vrot.lane.b32.xlu1 %v1223_v58, %s1661_s28 }
 0x282   : > { %v959_v60 = vpop.permute.xlu0 %958  ;;  %v961_v61 = vpop.permute.xlu1 %960  ;;  %v1216_v62 = vrot.slane %v1131_v59, %v1799_v7  ;;  %v1059_v24 = vrot.slane %v1052_v14, %v1799_v7 }
 0x283   : > { %v962_v63 = vsel %vm468_vm2, %v957_v43, %v959_v60  ;;  %v963_v0 = vsel %vm468_vm2, %v959_v60, %v961_v61  ;;  %v1082_v8 = vrot.slane %v961_v61, %v1799_v7 }
 0x284   : > { %v1224_v2 = vcombine.high %v1216_v62, %v1216_v62  ;;  %v1068_v1 = vcombine.low %v962_v63, %v963_v0 }
 0x285   : > { %1237 = vrot.lane.b32.xlu1 %v1216_v62, %s1661_s28  ;;  %v1516_v16 = vcombine.low %v1066_v13, %v1082_v8 }
 0x286   : > { %v969_v9 = vpop.permute.xlu0 %968  ;;  %1239 = vrot.lane.b32.xlu0 %v1224_v2, %s1661_s28  ;;  %v967_v4 = vpop.permute.xlu1 %966  ;;  %v1075_v15 = vrot.slane %v1068_v1, %v1799_v7 }
 0x287   : > { %v970_v11 = vsel %vm473_vm3, %v965_v10, %v967_v4  ;;  %v971_v12 = vsel %vm473_vm3, %v967_v4, %v969_v9  ;;  %v1098_v20 = vrot.slane %v969_v9, %v1799_v7  ;;  %v1191_v35 = vrot.slane %v1516_v16, %v1799_v7  ;;  %v1133_v9 = vld [vmem:[%s2062_s8] sm:$0xf]  ;;  %v1355_v4 = vpop.f32.mrf.mxu1 }
 0x288   : > { %v1084_v17 = vcombine.low %v970_v11, %v971_v12  ;;  %v1515_v27 = vcombine.low %v1059_v24, %v1075_v15 }
 0x289   : > { %v1357_v11 = vpop.f32.mrf.mxu1 }
 0x28a   : > { %v975_v18 = vpop.permute.xlu0 %974  ;;  %v977_v19 = vpop.permute.xlu1 %976  ;;  %v1091_v29 = vrot.slane %v1084_v17, %v1799_v7 }
 0x28b   : > { %v978_v21 = vsel %vm478_vm4, %v973_v45, %v975_v18  ;;  %v979_v22 = vsel %vm478_vm4, %v975_v18, %v977_v19  ;;  %v1114_v23 = vrot.slane %v977_v19, %v1799_v7  ;;  %v1184_v45 = vrot.slane %v1515_v27, %v1799_v7  ;;  %v1358_v13 = vpop.f32.mrf.mxu1 }
 0x28c   : > { %v1100_v25 = vcombine.low %v978_v21, %v979_v22 }
 0x28d   : > { %v1518_v26 = vcombine.low %v1098_v20, %v1114_v23 }
 0x28e   : > { %v1107_v30 = vrot.slane %v1100_v25, %v1799_v7  ;;  %v929_v32 = vpop.permute.xlu0 %928  ;;  %v927_v33 = vpop.permute.xlu1 %926 }
 0x28f   : > { %v1205_v36 = vrot.slane %v1518_v26, %v1799_v7  ;;  %v930_v37 = vsel %vm448_vm5, %v925_v44, %v927_v33  ;;  %v931_v38 = vsel %vm448_vm5, %v927_v33, %v929_v32  ;;  %v1018_v41 = vrot.slane %v929_v32, %v1799_v7  ;;  %v1132_v32 = vld [vmem:[%s2061_s7] sm:$0x3] }
 0x290   : > { %v1517_v6 = vcombine.low %v1091_v29, %v1107_v30  ;;  %v1004_v42 = vcombine.low %v930_v37, %v931_v38  ;;  %v1002_v44 = vrot.slane %v1934_v40, %v1799_v7  ;;  %v995_v40 = vrot.slane %v1510_v34, %v1799_v7 }
 0x291   : > { %v1208_v39 = vcombine.low %v1191_v35, %v1205_v36 }
 0x292   : > { %v935_v10 = vpop.permute.xlu0 %934  ;;  %v937_v43 = vpop.permute.xlu1 %936  ;;  %v1198_v48 = vrot.slane %v1517_v6, %v1799_v7  ;;  %v1512_v52 = vcombine.low %v1002_v44, %v1018_v41  ;;  %v1011_v53 = vrot.slane %v1004_v42, %v1799_v7 }
 0x293   : > { %v938_v49 = vsel %vm453_vm6, %v933_v47, %v935_v10  ;;  %v939_v50 = vsel %vm453_vm6, %v935_v10, %v937_v43  ;;  %1235 = vrot.lane.b32.xlu1 %v1208_v39, %s1661_s28  ;;  %v1034_v57 = vrot.slane %v937_v43, %v1799_v7 }
 0x294   : > { %v1207_v51 = vcombine.high %v1184_v45, %v1198_v48  ;;  %v1020_v54 = vcombine.low %v938_v49, %v939_v50  ;;  %v1206_v61 = vcombine.low %v1184_v45, %v1198_v48  ;;  %v1511_v63 = vcombine.low %v995_v40, %v1011_v53 }
 0x295   : > { %v1156_v3 = vrot.slane %v1512_v52, %v1799_v7 }
 0x296   : > { %v945_v55 = vpop.permute.xlu0 %944  ;;  %1233 = vrot.lane.b32.xlu0 %v1207_v51, %s1661_s28  ;;  %v943_v56 = vpop.permute.xlu1 %942  ;;  %v1027_v0 = vrot.slane %v1020_v54, %v1799_v7  ;;  %v1149_v8 = vrot.slane %v1511_v63, %v1799_v7 }
 0x297   : > { %v1050_v47 = vrot.slane %v945_v55, %v1799_v7  ;;  %v946_v58 = vsel %vm458_vm7, %v1960_v46, %v943_v56  ;;  %v947_v59 = vsel %vm458_vm7, %v943_v56, %v945_v55 }
 0x298   : > { %v1036_v60 = vcombine.low %v946_v58, %v947_v59 }
 0x299   : > { %v1514_v62 = vcombine.low %v1034_v57, %v1050_v47 }
 0x29a   : > { %v1043_v2 = vrot.slane %v1036_v60, %v1799_v7  ;;  %1231 = vrot.lane.b32.xlu0 %v1206_v61, %s1661_s28 }
 0x29b   : > { %v1170_v46 = vrot.slane %v1514_v62, %v1799_v7 }
 0x29c   : > { %v1513_v5 = vcombine.low %v1027_v0, %v1043_v2 }
 0x29d   : > { %v1173_v1 = vcombine.low %v1156_v3, %v1170_v46 }
 0x29e   : > { %v1163_v28 = vrot.slane %v1513_v5, %v1799_v7  ;;  %v1304_v7 = vld [vmem:[%s2064_s10] sm:$0xff] }
 0x29f   : > { %1229 = vrot.lane.b32.xlu0 %v1173_v1, %s1661_s28 }
 0x2a0   : > { %v1172_v34 = vcombine.high %v1149_v8, %v1163_v28  ;;  %v1171_v12 = vcombine.low %v1149_v8, %v1163_v28 }
 0x2a2   : > { %1227 = vrot.lane.b32.xlu1 %v1172_v34, %s1661_s28 }
 0x2a3   : > { %1136 = vperm.xlu0 %1605, %v1133_v9  }
 0x2a6   : > { %1225 = vrot.lane.b32.xlu1 %v1171_v12, %s1661_s28 }
 0x2aa   : > { %1307 = vperm.xlu1 %1606, %v1304_v7  }
 0x2f3   : > { %v1242_v14 = vpop.permute.xlu1 %1241 }
 0x2f7   : > { %v1238_v15 = vpop.permute.xlu1 %1237 }
 0x2f8   : > { %v1240_v16 = vpop.permute.xlu0 %1239 }
 0x2f9   : > { %v1247_v17 = vsel %vm605_vm9, %v1238_v15, %v1240_v16  ;;  %v1248_v18 = vsel %vm605_vm9, %v1240_v16, %v1242_v14 }
 0x2fa   : > { %v1257_v19 = vsel %vm625_vm10, %v1247_v17, 0  ;;  %1520 = vmatprep.subr.msk.bf16.mxu0 %vm625_vm10, %v1248_v18 }
 0x2fb   : > { %1273 = vmatpush1.bf16.msra.mxu0 %v1257_v19 }
 0x305   : > { %v1236_v20 = vpop.permute.xlu1 %1235 }
 0x308   : > { %v1234_v21 = vpop.permute.xlu0 %1233 }
 0x309   : > { %v1246_v22 = vsel %vm605_vm9, %v1234_v21, %v1236_v20 }
 0x30a   : > { %1274 = vmatprep.subr.bf16.mxu0 %v1246_v22 }
 0x30c   : > { %v1232_v23 = vpop.permute.xlu0 %1231 }
 0x30d   : > { %v1245_v24 = vsel %vm605_vm9, %v1232_v23, %v1234_v21 }
 0x30e   : > { %1275 = vmatpush1.bf16.msra.mxu0 %v1245_v24 }
 0x311   : > { %v1230_v25 = vpop.permute.xlu0 %1229 }
 0x314   : > { %v1228_v26 = vpop.permute.xlu1 %1227 }
 0x315   : > { %v1244_v27 = vsel %vm605_vm9, %v1228_v26, %v1230_v25 }
 0x316   : > { %1276 = vmatprep.subr.bf16.mxu0 %v1244_v27 }
 0x318   : > { %v1226_v29 = vpop.permute.xlu1 %1225 }
 0x319   : > { %v1243_v30 = vsel %vm605_vm9, %v1226_v29, %v1228_v26 }
 0x31a   : > { %1277 = vmatpush1.bf16.msra.mxu0 %v1243_v30 }
 0x31d   : > { %1521 = vmatmul.mubr.msk.bf16.vlgmr.msra.gmra.mxu0 %vm2077_vm0, %v1132_v32 }
 0x31e   : > { %v1137_v36 = vpop.permute.xlu0 %1136 }
 0x325   : > { %v1308_v33 = vpop.permute.xlu1 %1307 }
 0x326   : > { %v1354_v35 = vadd.f32 %v1353_v31, %v1308_v33  ;;  %v1356_v38 = vadd.f32 %v1355_v4, %v1308_v33 }
 0x328   : > { %v1364_v41 = vrot.slane %v1354_v35, 4  ;;  %v1365_v45 = vrot.slane %v1356_v38, 4 }
 0x3dd   : > { %v1296_v37 = vpop.f32.mrf.mxu0 }
 0x3de   : > { %v1297_v6 = vadd.f32 %v1296_v37, %v1137_v36 }
 0x3df   : > { %v1298_v39 = vpop.f32.mrf.mxu0 }
 0x3e0   : > { %v1360_v42 = vmul.f32 %v1354_v35, %v1297_v6  ;;  %v1299_v10 = vadd.f32 %v1298_v39, %v1137_v36 }
 0x3e1   : > { %v1300_v43 = vpop.f32.mrf.mxu0 }
 0x3e2   : > { %v1368_v48 = vadd.f32 %v1364_v41, %v1360_v42  ;;  %v1361_v49 = vmul.f32 %v1356_v38, %v1299_v10 }
 0x3e3   : > { %v1301_v50 = vpop.f32.mrf.mxu0 }
 0x3e4   : > { %v1369_v44 = vadd.f32 %v1365_v45, %v1361_v49  ;;  %v1370_v51 = vmax.f32 %v1368_v48, 0.0 }
 0x3e6   : > { %v1371_v52 = vmax.f32 %v1369_v44, 0.0 }
 0x3e8   : > { %v1374_v53 = vcombine.low %v1370_v51, %v1371_v52 }
 0x3ea   : > { %1376 = vst [vmem:[%s1767_s16] sm:$0xff] %v1374_v53 }
 0x3eb PF: > { %s2078_s25 = sld [smem:[#allocation11_spill]] }
 0x3ec   : > { %s2079_s17 = sld [smem:[#allocation9_spill]] }
 0x3ed   : > { %s2080_s18 = sld [smem:[#allocation10_spill]] }
 0x3ee   : > { %s2081_s19 = sld [smem:[#allocation12_spill]] }
 0x3ef   : > { %s2082_s20 = sld [smem:[#allocation13_spill]] }
 0x3f1   : > { %s21_s21 = sadd.s32 1, %s2078_s25  }
 0x3f2   : > { %p18_p10 = scmp.ge.s32.totalorder %s21_s21, 6  }
 0x3f4   :  { %20 = sbr.rel (!%p18_p10) target bundleno = 3 (0x3), region = 171 }
 0x3f9   :  { %1407 = vsyncmov [#allocation4] }
 0x3fc   :  { %s1408_s16 = vpop.sfrf %1407 }
 0x3fd   :  { %p1526_p11 = scmp.ne.s32.totalorder %s1408_s16, 0 }
 0x3ff   :  { %1412 = shalt.err (%p1526_p11)  }
 0x400   :  { %1414 = vsyncmov [#allocation4 + $0x1] }
 0x403   :  { %s1415_s27 = vpop.sfrf %1414 }
 0x404   :  { %p1527_p12 = scmp.ne.s32.totalorder %s1415_s27, 0 }
 0x406   :  { %1419 = shalt.err (%p1527_p12)  }

</bundles_post_ra>
